<compile_context>
chip_gen: v6e
topology: v6e:2x2x1
jax: 0.10.0
libtpu: 0.0.40
codegen_flags: <defaults>
</compile_context>

<pallas_src>
import jax
import jax.numpy as jnp
from jax.experimental import pallas as pl
from jax.experimental.pallas import tpu as pltpu


# ----------------------------------------------------------------------------
# Per-generation hardware heuristics
# ----------------------------------------------------------------------------
def _device_kind():
    try:
        return jax.devices()[0].device_kind.lower()
    except Exception:
        return ""


def _is_v7x():
    return "v7" in _device_kind()


def _num_tensorcores():
    # v7x has 2 TensorCores per chip; v5e/v6e have 1.
    return 2 if _is_v7x() else 1


def _vmem_limit_bytes():
    # v7x: 64 MiB physical VMEM per core -> stay <= ~48 MiB.
    # v5e/v6e: 128 MiB physical -> 64 MiB scoped limit is comfortable.
    return (48 if _is_v7x() else 64) * 1024 * 1024


def _choose_batch_tile(B, S, per_batch_bytes, resident_bytes, target_rows=512):
    """Largest divisor of B keeping bt*S near target_rows and the working set
    (double-buffered blocks + resident weights) inside the VMEM budget.
    Only on 2-TensorCore chips (v7x) do we force >= 2 'parallel' grid steps."""
    budget = _vmem_limit_bytes()
    avail = max(budget - resident_bytes, per_batch_bytes)
    cap = max(min(avail // max(per_batch_bytes, 1),
                  max(target_rows // max(S, 1), 1)), 1)
    min_steps = 2 if (_num_tensorcores() >= 2 and B > 1) else 1
    best = 1
    for d in range(1, B + 1):
        if B % d == 0 and d <= cap and (B // d) >= min_steps:
            best = max(best, d)
    return best


def _choose_time_tile(T, cap=32):
    """Timesteps per GRU grid step: whole T if small, else the largest
    divisor of T that is a multiple of 8 (sublane constraint) and <= cap."""
    if T <= cap:
        return T
    best = None
    for d in range(8, cap + 1, 8):
        if T % d == 0:
            best = d
    if best is not None:
        return best
    # TODO(synk): ragged T with no multiple-of-8 divisor falls back to a fully
    # unrolled single grid step; switch to a dynamic fori_loop body if needed.
    return T


# ----------------------------------------------------------------------------
# Attention kernels
# ----------------------------------------------------------------------------
def _attn_probs(x_ref, hb_ref, mfill_ref, w1_ref, vsum_ref, bvs_ref, approx):
    """Shared core: returns (x_f32, attention_probs) for the current block."""
    bt, s, h = x_ref.shape
    x = x_ref[...]                                        # (bt, S, H) f32
    w1 = w1_ref[...]                                      # (H, H) compute dtype
    # pre-activation: x @ W1 (MXU, f32 accumulation) + hoisted (h0@W2 + bW).
    # NOTE: the tanh below issues bt*S*H transcendentals into the single EUP
    # slot; at large blocks the kernel may be EUP-bound rather than MXU-bound
    # (confirm with a bundle dump before further MXU-side tuning).
    pre = jnp.dot(x.reshape(bt * s, h).astype(w1.dtype), w1,
                  preferred_element_type=jnp.float32).reshape(bt, s, h)
    q = jnp.tanh(pre + hb_ref[...])                       # (bt, S, H) f32

    # attn_sum = sum_j(Q @ V^T + bV)[:, j] == Q . rowsum(V^T) + sum(bV)
    vsum = vsum_ref[...].reshape(1, 1, h)
    scores = jnp.sum(q * vsum, axis=-1) + bvs_ref[...]    # (bt, S)

    m = mfill_ref[...].reshape(bt, s)                     # 0.0 or -1e9 (f32)
    scores = jnp.where(m == 0.0, scores, m)               # exact masked_fill

    # softmax over the sequence (lane) axis, all in f32.
    mx = jnp.max(scores, axis=-1, keepdims=True)
    e = jnp.exp(scores - mx)
    denom = jnp.sum(e, axis=-1, keepdims=True)
    attn = e * pl.reciprocal(denom, approx=approx)        # (bt, S)
    return x, attn


def _make_attn_kernel(approx):
    def kernel(x_ref, hb_ref, mfill_ref, w1_ref, vsum_ref, bvs_ref,
               out_ref, attn_ref):
        bt, s, _ = x_ref.shape
        x, attn = _attn_probs(x_ref, hb_ref, mfill_ref, w1_ref, vsum_ref,
                              bvs_ref, approx)
        attn_ref[...] = attn.reshape(bt, 1, s)            # lane-dense output
        out_ref[...] = attn[:, :, None] * x               # (bt, S, H) f32
    return kernel


def _make_attn_gi_kernel(approx):
    def kernel(x_ref, hb_ref, mfill_ref, w1_ref, vsum_ref, bvs_ref,
               wih_ref, bih_ref, gi_ref):
        bt, s, h = x_ref.shape
        x, attn = _attn_probs(x_ref, hb_ref, mfill_ref, w1_ref, vsum_ref,
                              bvs_ref, approx)
        attn_out = attn[:, :, None] * x                   # (bt, S, H) f32
        # Fused GRU input projection (saves the HBM round trip of attn_out).
        gi = jnp.dot(attn_out.reshape(bt * s, h).astype(wih_ref.dtype),
                     wih_ref[...], preferred_element_type=jnp.float32)
        gi_ref[...] = (gi + bih_ref[...]).reshape(bt, s, gi.shape[-1])
    return kernel


def _attn_prep(inputs, hidden_states, attn_params, mask):
    B, S, H = inputs.shape
    W1, W2, bW, Vt, bV = attn_params
    x = inputs.astype(jnp.float32)
    # Hoisted hidden-state term (one batched matmul, bW folded in).
    hb = (jnp.dot(hidden_states[0].astype(jnp.float32), W2) + bW).reshape(B, 1, H)
    # V matmul elimination: only its row-sum (and bias sum) is needed.
    vsum = jnp.sum(Vt, axis=1).reshape(1, H).astype(jnp.float32)
    bvs = jnp.sum(bV).reshape(1, 1).astype(jnp.float32)
    if mask is None:
        mfill = jnp.zeros((B, 1, S), jnp.float32)
    else:
        mfill = jnp.where(mask.reshape(B, 1, S) == 0,
                          jnp.float32(-1000000000.0), jnp.float32(0.0))
    return x, hb, vsum, bvs, mfill


def attn_forward(inputs, hidden_states, attn_params, mask=None,
                 compute_dtype=jnp.float32):
    """Standalone Attn.forward: returns (attn * inputs (B,S,H), attn (B,S,1))."""
    B, S, H = inputs.shape
    x, hb, vsum, bvs, mfill = _attn_prep(inputs, hidden_states, attn_params, mask)
    w1c = attn_params[0].astype(compute_dtype)
    wb = jnp.dtype(compute_dtype).itemsize
    per_batch = 2 * 4 * (2 * S * H + S + H)               # dbl-buffered x/out/attn/hb
    resident = H * H * wb + 4 * (H + 1)                   # W1 + vsum + bvs
    bt = _choose_batch_tile(B, S, per_batch, resident)
    kernel = _make_attn_kernel(approx=(compute_dtype != jnp.float32))

    out, attn3 = pl.pallas_call(
        kernel,
        out_shape=(jax.ShapeDtypeStruct((B, S, H), jnp.float32),
                   jax.ShapeDtypeStruct((B, 1, S), jnp.float32)),
        grid=(B // bt,),
        in_specs=[
            pl.BlockSpec((bt, S, H), lambda b: (b, 0, 0)),   # inputs
            pl.BlockSpec((bt, 1, H), lambda b: (b, 0, 0)),   # h0 @ W2 + bW
            pl.BlockSpec((bt, 1, S), lambda b: (b, 0, 0)),   # mask fill (f32)
            pl.BlockSpec((H, H), lambda b: (0, 0)),          # W1
            pl.BlockSpec((1, H), lambda b: (0, 0)),          # rowsum(V^T)
            pl.BlockSpec((1, 1), lambda b: (0, 0)),          # sum(bV)
        ],
        out_specs=(
            pl.BlockSpec((bt, S, H), lambda b: (b, 0, 0)),
            pl.BlockSpec((bt, 1, S), lambda b: (b, 0, 0)),
        ),
        compiler_params=pltpu.CompilerParams(
            dimension_semantics=("parallel",),
            vmem_limit_bytes=_vmem_limit_bytes()),
    )(x, hb, mfill, w1c, vsum, bvs)

    return out, jnp.swapaxes(attn3, 1, 2)                 # (B, S, 1) as in module


def attn_gi_forward(inputs, hidden_states, attn_params, wih_t, b_ih, mask=None,
                    compute_dtype=jnp.float32):
    """Fused Attn + GRU input projection: gi = (attn*x) @ W_ih^T + b_ih,
    shape (B, S, 3H).  The attention vector (discarded by the decoder) is
    never materialized."""
    B, S, H = inputs.shape
    x, hb, vsum, bvs, mfill = _attn_prep(inputs, hidden_states, attn_params, mask)
    w1c = attn_params[0].astype(compute_dtype)
    wihc = wih_t.astype(compute_dtype)                    # (H, 3H)
    bih = b_ih.reshape(1, 3 * H).astype(jnp.float32)
    wb = jnp.dtype(compute_dtype).itemsize
    per_batch = 2 * 4 * (S * H + S * 3 * H + S + H)       # dbl-buffered x/gi/hb/mask
    resident = 4 * H * H * wb + 4 * (4 * H + 1)           # W1 + W_ih (+ small)
    bt = _choose_batch_tile(B, S, per_batch, resident)
    # TODO(synk): at very large H (f32 H >= ~2048 on v7x) W1/W_ih no longer fit
    # resident in VMEM; tile them along the output-H axis with an extra
    # "arbitrary" grid axis + pl.when-guarded accumulator.
    kernel = _make_attn_gi_kernel(approx=(compute_dtype != jnp.float32))

    gi = pl.pallas_call(
        kernel,
        out_shape=jax.ShapeDtypeStruct((B, S, 3 * H), jnp.float32),
        grid=(B // bt,),
        in_specs=[
            pl.BlockSpec((bt, S, H), lambda b: (b, 0, 0)),   # inputs
            pl.BlockSpec((bt, 1, H), lambda b: (b, 0, 0)),   # h0 @ W2 + bW
            pl.BlockSpec((bt, 1, S), lambda b: (b, 0, 0)),   # mask fill (f32)
            pl.BlockSpec((H, H), lambda b: (0, 0)),          # W1
            pl.BlockSpec((1, H), lambda b: (0, 0)),          # rowsum(V^T)
            pl.BlockSpec((1, 1), lambda b: (0, 0)),          # sum(bV)
            pl.BlockSpec((H, 3 * H), lambda b: (0, 0)),      # W_ih^T
            pl.BlockSpec((1, 3 * H), lambda b: (0, 0)),      # b_ih
        ],
        out_specs=pl.BlockSpec((bt, S, 3 * H), lambda b: (b, 0, 0)),
        compiler_params=pltpu.CompilerParams(
            dimension_semantics=("parallel",),
            vmem_limit_bytes=_vmem_limit_bytes()),
    )(x, hb, mfill, w1c, vsum, bvs, wihc, bih)
    return gi


# ----------------------------------------------------------------------------
# GRU recurrence kernel (single layer, sequential over the time grid)
# ----------------------------------------------------------------------------
def _make_gru_kernel(tt):
    def kernel(gi_ref, h0_ref, whh_ref, bhh_ref, out_ref, h_sc):
        @pl.when(pl.program_id(0) == 0)
        def _():
            h_sc[...] = h0_ref[...]

        hd = h0_ref.shape[-1]
        whh = whh_ref[...]                                # (H, 3H) compute dtype
        bhh = bhh_ref[...]                                # (1, 3H) f32
        gi_blk = gi_ref[...]                              # (B, Tt, 3H) f32, one DMA
        h = h_sc[...]                                     # (B, H) f32 carry
        hs = []
        # Statically unrolled recurrence: one fused (B,H)x(H,3H) MXU pass and
        # one f32 gate slab per timestep; h stays in registers/VMEM.
        for i in range(tt):
            gh = jnp.dot(h.astype(whh.dtype), whh,
                         preferred_element_type=jnp.float32) + bhh   # (B, 3H)
            gi = gi_blk[:, i, :]                          # (B, 3H)
            r = 1.0 / (1.0 + jnp.exp(-(gi[:, :hd] + gh[:, :hd])))
            z = 1.0 / (1.0 + jnp.exp(-(gi[:, hd:2 * hd] + gh[:, hd:2 * hd])))
            n = jnp.tanh(gi[:, 2 * hd:] + r * gh[:, 2 * hd:])
            h = (1.0 - z) * n + z * h
            hs.append(h)
        h_sc[...] = h
        out_ref[...] = jnp.stack(hs, axis=1)              # (B, Tt, H) lane-dense
    return kernel


def gru_recurrence(gi, h0, Whh_T, b_hh, compute_dtype=jnp.float32):
    """gi: (B, T, 3H) precomputed input projection; h0: (B, H) f32.
    Returns dec (B, T, H) and h_final (1, B, H)."""
    B, T, H3 = gi.shape
    H = H3 // 3
    tt = _choose_time_tile(T)
    whh = Whh_T.astype(compute_dtype)                     # fused (H, 3H) weights
    bhh = b_hh.reshape(1, H3).astype(jnp.float32)

    dec = pl.pallas_call(
        _make_gru_kernel(tt),
        out_shape=jax.ShapeDtypeStruct((B, T, H), jnp.float32),
        grid=(T // tt,),
        in_specs=[
            pl.BlockSpec((B, tt, H3), lambda t: (0, t, 0)),  # gi block (1 DMA/step)
            pl.BlockSpec((B, H), lambda t: (0, 0)),          # h0
            pl.BlockSpec((H, H3), lambda t: (0, 0)),         # W_hh^T (fused gates)
            pl.BlockSpec((1, H3), lambda t: (0, 0)),         # b_hh (fused gates)
        ],
        out_specs=pl.BlockSpec((B, tt, H), lambda t: (0, t, 0)),
        scratch_shapes=[pltpu.VMEM((B, H), jnp.float32)],
        compiler_params=pltpu.CompilerParams(
            dimension_semantics=("arbitrary",),              # sequential carry
            vmem_limit_bytes=_vmem_limit_bytes()),
    )(gi, h0.astype(jnp.float32), whh, bhh)

    h_final = dec[:, T - 1, :][None]                      # (1, B, H)
    return dec, h_final


def gru_forward(x, h0, gru_params, compute_dtype=jnp.float32):
    """Standalone GRU: x (B,T,H), h0 (B,H).  Input projection hoisted to one
    XLA matmul, recurrence in the Pallas kernel."""
    B, T, H = x.shape
    Wih_T, b_ih, Whh_T, b_hh = gru_params
    gi = (jnp.dot(x.reshape(B * T, H), Wih_T) + b_ih).reshape(B, T, 3 * H)
    return gru_recurrence(gi, h0, Whh_T, b_hh, compute_dtype)


# ----------------------------------------------------------------------------
# Full DecoderAttn forward
# ----------------------------------------------------------------------------
def decoder_attn_forward(inputs, hidden_states, params, mask=None,
                         compute_dtype=jnp.float32):
    attn_params, gru_params = params
    Wih_T, b_ih, Whh_T, b_hh = gru_params
    # TODO(synk): multi-layer GRU stacking (num_layers > 1) not implemented.
    assert hidden_states.shape[0] == 1
    # TODO(synk): nn.Dropout(p=0.0) is the identity; training-mode dropout skipped.
    gi = attn_gi_forward(inputs, hidden_states, attn_params, Wih_T, b_ih,
                         mask, compute_dtype)
    dec, h_final = gru_recurrence(gi, hidden_states[0].astype(jnp.float32),
                                  Whh_T, b_hh, compute_dtype)
    return dec, h_final


# ----------------------------------------------------------------------------
# Parameter init (mimics PyTorch defaults; weights stored as (in, out))
# ----------------------------------------------------------------------------
def init_params(key, hidden_size):
    H = hidden_size
    k = jax.random.split(key, 8)
    # Attn.W: Linear(2H -> H); Attn.V: Linear(H -> H)
    bnd_w = 1.0 / jnp.sqrt(2.0 * H)
    Wt = jax.random.uniform(k[0], (2 * H, H), jnp.float32, -bnd_w, bnd_w)
    bW = jax.random.uniform(k[1], (1, H), jnp.float32, -bnd_w, bnd_w)
    bnd_v = 1.0 / jnp.sqrt(1.0 * H)
    Vt = jax.random.uniform(k[2], (H, H), jnp.float32, -bnd_v, bnd_v)
    bV = jax.random.uniform(k[3], (1, H), jnp.float32, -bnd_v, bnd_v)
    W1, W2 = Wt[:H], Wt[H:]                               # concat order [inputs, hidden]
    attn_params = (W1, W2, bW, Vt, bV)
    # GRU (1 layer, input size == hidden size), gate order [r, z, n]
    bnd_g = 1.0 / jnp.sqrt(1.0 * H)
    Wih_T = jax.random.uniform(k[4], (H, 3 * H), jnp.float32, -bnd_g, bnd_g)
    Whh_T = jax.random.uniform(k[5], (H, 3 * H), jnp.float32, -bnd_g, bnd_g)
    b_ih = jax.random.uniform(k[6], (3 * H,), jnp.float32, -bnd_g, bnd_g)
    b_hh = jax.random.uniform(k[7], (3 * H,), jnp.float32, -bnd_g, bnd_g)
    gru_params = (Wih_T, b_ih, Whh_T, b_hh)
    return attn_params, gru_params


# ----------------------------------------------------------------------------
# Pure-JAX references
# ----------------------------------------------------------------------------
def attn_reference(inputs, hidden_states, attn_params, mask=None):
    B, S, H = inputs.shape
    W1, W2, bW, Vt, bV = attn_params
    h0 = hidden_states[0].reshape(B, 1, H)
    hidden_rep = jnp.broadcast_to(h0, (B, S, H))
    Wt = jnp.concatenate([W1, W2], axis=0)
    input_attn = jnp.concatenate([inputs, hidden_rep], axis=2)
    Q = jnp.tanh(input_attn @ Wt + bW)
    K = Q @ Vt + bV
    attn_sum = jnp.sum(K, axis=2, keepdims=True)
    if mask is not None:
        attn_sum = jnp.where(mask[..., None] == 0, -1000000000.0, attn_sum)
    attn = jax.nn.softmax(attn_sum, axis=1)
    return attn * inputs, attn


def gru_reference(x, h0, gru_params):
    B, T, H = x.shape
    Wih_T, b_ih, Whh_T, b_hh = gru_params

    def step(h, x_t):
        gi = x_t @ Wih_T + b_ih
        gh = h @ Whh_T + b_hh
        r = jax.nn.sigmoid(gi[:, :H] + gh[:, :H])
        z = jax.nn.sigmoid(gi[:, H:2 * H] + gh[:, H:2 * H])
        n = jnp.tanh(gi[:, 2 * H:] + r * gh[:, 2 * H:])
        h_new = (1.0 - z) * n + z * h
        return h_new, h_new

    hT, ys = jax.lax.scan(step, h0, jnp.swapaxes(x, 0, 1))
    return jnp.swapaxes(ys, 0, 1), hT[None]


def decoder_attn_reference(inputs, hidden_states, params, mask=None):
    attn_params, gru_params = params
    attn_out, _ = attn_reference(inputs, hidden_states, attn_params, mask)
    return gru_reference(attn_out, hidden_states[0], gru_params)


if __name__ == "__main__":
    B, S, H, L = 2, 8, 32, 1
    key = jax.random.PRNGKey(0)
    kx, kh, kp = jax.random.split(key, 3)
    inputs = jax.random.normal(kx, (B, S, H), jnp.float32)
    hidden_states = jax.random.normal(kh, (L, B, H), jnp.float32)
    # Mask out the last 3 positions of the second sequence.
    mask = jnp.ones((B, S), dtype=jnp.int32).at[1, S - 3:].set(0)
    params = init_params(kp, H)

    # Full DecoderAttn forward (f32 path) vs. pure-JAX reference.
    dec, h_out = decoder_attn_forward(inputs, hidden_states, params, mask)
    dec = jax.block_until_ready(dec)
    h_out = jax.block_until_ready(h_out)
    dec_ref, h_ref = decoder_attn_reference(inputs, hidden_states, params, mask)
    assert dec.shape == (B, S, H) and h_out.shape == (L, B, H)
    assert jnp.allclose(dec, dec_ref, atol=1e-4, rtol=1e-4)
    assert jnp.allclose(h_out, h_ref, atol=1e-4, rtol=1e-4)

    # Attention sub-module check (exact f32 path, tight tolerance).
    attn_params, gru_params = params
    out, attn = attn_forward(inputs, hidden_states, attn_params, mask)
    out = jax.block_until_ready(out)
    out_ref, attn_ref = attn_reference(inputs, hidden_states, attn_params, mask)
    assert out.shape == (B, S, H) and attn.shape == (B, S, 1)
    assert jnp.allclose(out, out_ref, atol=1e-5, rtol=1e-5)
    assert jnp.allclose(attn, attn_ref, atol=1e-5, rtol=1e-5)

    # Standalone GRU recurrence check (f32 path).
    gdec, gh = gru_forward(out_ref, hidden_states[0], gru_params)
    gdec = jax.block_until_ready(gdec)
    gdec_ref, gh_ref = gru_reference(out_ref, hidden_states[0], gru_params)
    assert jnp.allclose(gdec, gdec_ref, atol=1e-4, rtol=1e-4)
    assert jnp.allclose(gh, gh_ref, atol=1e-4, rtol=1e-4)

    # bf16 MXU fast path (W1/W_ih/W_hh in bf16, f32 accumulation & softmax;
    # approx reciprocal + bf16 error compounding through the GRU recurrence
    # -> looser tolerance than the exact f32 path).
    dec_bf, h_bf = decoder_attn_forward(inputs, hidden_states, params, mask,
                                        compute_dtype=jnp.bfloat16)
    dec_bf = jax.block_until_ready(dec_bf)
    assert jnp.allclose(dec_bf, dec_ref, atol=1e-1, rtol=1e-1)
    assert jnp.allclose(h_bf, h_ref, atol=1e-1, rtol=1e-1)

    print("KERNEL_OK")
</pallas_src>

<mosaic_0001>
module attributes {stable_mosaic.version = 11 : i64} {
  func.func @kernel(%arg0: i32, %arg1: memref<2x8x32xf32, #tpu.memory_space<vmem>>, %arg2: memref<2x1x32xf32, #tpu.memory_space<vmem>>, %arg3: memref<2x1x8xf32, #tpu.memory_space<vmem>>, %arg4: memref<32x32xf32, #tpu.memory_space<vmem>>, %arg5: memref<1x32xf32, #tpu.memory_space<vmem>>, %arg6: memref<1x1xf32, #tpu.memory_space<vmem>>, %arg7: memref<32x96xf32, #tpu.memory_space<vmem>>, %arg8: memref<1x96xf32, #tpu.memory_space<vmem>>, %arg9: memref<2x8x96xf32, #tpu.memory_space<vmem>>) attributes {dimension_semantics = [#tpu.dimension_semantics<parallel>], iteration_bounds = array<i64: 1>, scalar_prefetch = 0 : i64, scratch_operands = 0 : i64, tpu.core_type = #tpu.core_type<tc>, window_params = [{transform_indices = @transform_0, window_bounds = array<i64: 2, 8, 32>}, {transform_indices = @transform_1, window_bounds = array<i64: 2, 1, 32>}, {transform_indices = @transform_2, window_bounds = array<i64: 2, 1, 8>}, {pipeline_mode = #tpu.pipeline_mode<synchronous>, transform_indices = @transform_3, window_bounds = array<i64: 32, 32>}, {pipeline_mode = #tpu.pipeline_mode<synchronous>, transform_indices = @transform_4, window_bounds = array<i64: 1, 32>}, {pipeline_mode = #tpu.pipeline_mode<synchronous>, transform_indices = @transform_5, window_bounds = array<i64: 1, 1>}, {pipeline_mode = #tpu.pipeline_mode<synchronous>, transform_indices = @transform_6, window_bounds = array<i64: 32, 96>}, {pipeline_mode = #tpu.pipeline_mode<synchronous>, transform_indices = @transform_7, window_bounds = array<i64: 1, 96>}, {transform_indices = @transform_8, window_bounds = array<i64: 2, 8, 96>}]} {
    %c0 = arith.constant 0 : index
    %c0_0 = arith.constant 0 : index
    %c0_1 = arith.constant 0 : index
    %0 = vector.load %arg1[%c0, %c0_0, %c0_1] : memref<2x8x32xf32, #tpu.memory_space<vmem>>, vector<2x8x32xf32>
    %c0_2 = arith.constant 0 : index
    %c0_3 = arith.constant 0 : index
    %1 = vector.load %arg4[%c0_2, %c0_3] : memref<32x32xf32, #tpu.memory_space<vmem>>, vector<32x32xf32>
    %2 = vector.shape_cast %0 : vector<2x8x32xf32> to vector<16x32xf32>
    %cst = arith.constant dense<0.000000e+00> : vector<16x32xf32>
    %3 = tpu.matmul %2, %1, %cst {dimension_numbers = #tpu.dot_dimension_numbers<[1], [0], [0], [1], [0, 0, 1, 1], [], []>} : vector<16x32xf32>, vector<32x32xf32>, vector<16x32xf32> -> vector<16x32xf32>
    %4 = vector.shape_cast %3 : vector<16x32xf32> to vector<2x8x32xf32>
    %c0_4 = arith.constant 0 : index
    %c0_5 = arith.constant 0 : index
    %c0_6 = arith.constant 0 : index
    %5 = vector.load %arg2[%c0_4, %c0_5, %c0_6] : memref<2x1x32xf32, #tpu.memory_space<vmem>>, vector<2x1x32xf32>
    %6 = vector.broadcast %5 : vector<2x1x32xf32> to vector<2x8x32xf32>
    %7 = arith.addf %4, %6 : vector<2x8x32xf32>
    %8 = math.tanh %7 : vector<2x8x32xf32>
    %c0_7 = arith.constant 0 : index
    %c0_8 = arith.constant 0 : index
    %9 = vector.load %arg5[%c0_7, %c0_8] : memref<1x32xf32, #tpu.memory_space<vmem>>, vector<1x32xf32>
    %10 = vector.shape_cast %9 : vector<1x32xf32> to vector<1x1x32xf32>
    %11 = vector.broadcast %10 : vector<1x1x32xf32> to vector<2x8x32xf32>
    %12 = arith.mulf %8, %11 : vector<2x8x32xf32>
    %cst_9 = arith.constant dense<0.000000e+00> : vector<2x8xf32>
    %13 = vector.multi_reduction <add>, %12, %cst_9 [2] : vector<2x8x32xf32> to vector<2x8xf32>
    %c0_10 = arith.constant 0 : index
    %c0_11 = arith.constant 0 : index
    %14 = vector.load %arg6[%c0_10, %c0_11] : memref<1x1xf32, #tpu.memory_space<vmem>>, vector<1x1xf32>
    %15 = vector.broadcast %14 : vector<1x1xf32> to vector<2x8xf32>
    %16 = arith.addf %13, %15 : vector<2x8xf32>
    %c0_12 = arith.constant 0 : index
    %c0_13 = arith.constant 0 : index
    %c0_14 = arith.constant 0 : index
    %17 = vector.load %arg3[%c0_12, %c0_13, %c0_14] : memref<2x1x8xf32, #tpu.memory_space<vmem>>, vector<2x1x8xf32>
    %18 = vector.shape_cast %17 : vector<2x1x8xf32> to vector<2x8xf32>
    %cst_15 = arith.constant 0.000000e+00 : f32
    %19 = vector.broadcast %cst_15 : f32 to vector<2x8xf32>
    %20 = arith.cmpf oeq, %18, %19 : vector<2x8xf32>
    %21 = arith.select %20, %16, %18 : vector<2x8xi1>, vector<2x8xf32>
    %cst_16 = arith.constant dense<0xFF800000> : vector<2xf32>
    %22 = vector.multi_reduction <maximumf>, %21, %cst_16 [1] : vector<2x8xf32> to vector<2xf32>
    %23 = vector.shape_cast %22 : vector<2xf32> to vector<2x1xf32>
    %24 = vector.broadcast %23 : vector<2x1xf32> to vector<2x8xf32>
    %25 = arith.subf %21, %24 : vector<2x8xf32>
    %26 = math.exp %25 : vector<2x8xf32>
    %cst_17 = arith.constant dense<0.000000e+00> : vector<2xf32>
    %27 = vector.multi_reduction <add>, %26, %cst_17 [1] : vector<2x8xf32> to vector<2xf32>
    %28 = vector.shape_cast %27 : vector<2xf32> to vector<2x1xf32>
    %29 = tpu.reciprocal %28 : vector<2x1xf32> -> vector<2x1xf32>
    %30 = vector.broadcast %29 : vector<2x1xf32> to vector<2x8xf32>
    %31 = arith.mulf %26, %30 : vector<2x8xf32>
    %32 = vector.shape_cast %31 : vector<2x8xf32> to vector<2x8x1xf32>
    %33 = vector.broadcast %32 : vector<2x8x1xf32> to vector<2x8x32xf32>
    %34 = arith.mulf %33, %0 : vector<2x8x32xf32>
    %35 = vector.shape_cast %34 : vector<2x8x32xf32> to vector<16x32xf32>
    %c0_18 = arith.constant 0 : index
    %c0_19 = arith.constant 0 : index
    %36 = vector.load %arg7[%c0_18, %c0_19] : memref<32x96xf32, #tpu.memory_space<vmem>>, vector<32x96xf32>
    %cst_20 = arith.constant dense<0.000000e+00> : vector<16x96xf32>
    %37 = tpu.matmul %35, %36, %cst_20 {dimension_numbers = #tpu.dot_dimension_numbers<[1], [0], [0], [1], [0, 0, 1, 1], [], []>} : vector<16x32xf32>, vector<32x96xf32>, vector<16x96xf32> -> vector<16x96xf32>
    %c0_21 = arith.constant 0 : index
    %c0_22 = arith.constant 0 : index
    %38 = vector.load %arg8[%c0_21, %c0_22] : memref<1x96xf32, #tpu.memory_space<vmem>>, vector<1x96xf32>
    %39 = vector.broadcast %38 : vector<1x96xf32> to vector<16x96xf32>
    %40 = arith.addf %37, %39 : vector<16x96xf32>
    %41 = vector.shape_cast %40 : vector<16x96xf32> to vector<2x8x96xf32>
    %c0_23 = arith.constant 0 : index
    %c0_24 = arith.constant 0 : index
    %c0_25 = arith.constant 0 : index
    %42 = vector.load %arg9[%c0_23, %c0_24, %c0_25] : memref<2x8x96xf32, #tpu.memory_space<vmem>>, vector<2x8x96xf32>
    tpu.vector_store %arg9[%c0_23, %c0_24, %c0_25], %41 {strides = array<i32>} : memref<2x8x96xf32, #tpu.memory_space<vmem>>, vector<2x8x96xf32>,
    return
  }
  func.func @transform_0(%arg0: i32) -> (i32, i32, i32) {
    %c0_i32 = arith.constant 0 : i32
    %c0_i32_0 = arith.constant 0 : i32
    %c0_i32_1 = arith.constant 0 : i32
    return %arg0, %c0_i32, %c0_i32_0 : i32, i32, i32
  }
  func.func @transform_1(%arg0: i32) -> (i32, i32, i32) {
    %c0_i32 = arith.constant 0 : i32
    %c0_i32_0 = arith.constant 0 : i32
    %c0_i32_1 = arith.constant 0 : i32
    return %arg0, %c0_i32, %c0_i32_0 : i32, i32, i32
  }
  func.func @transform_2(%arg0: i32) -> (i32, i32, i32) {
    %c0_i32 = arith.constant 0 : i32
    %c0_i32_0 = arith.constant 0 : i32
    %c0_i32_1 = arith.constant 0 : i32
    return %arg0, %c0_i32, %c0_i32_0 : i32, i32, i32
  }
  func.func @transform_3(%arg0: i32) -> (i32, i32) {
    %c0_i32 = arith.constant 0 : i32
    %c0_i32_0 = arith.constant 0 : i32
    %c0_i32_1 = arith.constant 0 : i32
    return %c0_i32, %c0_i32_0 : i32, i32
  }
  func.func @transform_4(%arg0: i32) -> (i32, i32) {
    %c0_i32 = arith.constant 0 : i32
    %c0_i32_0 = arith.constant 0 : i32
    %c0_i32_1 = arith.constant 0 : i32
    return %c0_i32, %c0_i32_0 : i32, i32
  }
  func.func @transform_5(%arg0: i32) -> (i32, i32) {
    %c0_i32 = arith.constant 0 : i32
    %c0_i32_0 = arith.constant 0 : i32
    %c0_i32_1 = arith.constant 0 : i32
    return %c0_i32, %c0_i32_0 : i32, i32
  }
  func.func @transform_6(%arg0: i32) -> (i32, i32) {
    %c0_i32 = arith.constant 0 : i32
    %c0_i32_0 = arith.constant 0 : i32
    %c0_i32_1 = arith.constant 0 : i32
    return %c0_i32, %c0_i32_0 : i32, i32
  }
  func.func @transform_7(%arg0: i32) -> (i32, i32) {
    %c0_i32 = arith.constant 0 : i32
    %c0_i32_0 = arith.constant 0 : i32
    %c0_i32_1 = arith.constant 0 : i32
    return %c0_i32, %c0_i32_0 : i32, i32
  }
  func.func @transform_8(%arg0: i32) -> (i32, i32, i32) {
    %c0_i32 = arith.constant 0 : i32
    %c0_i32_0 = arith.constant 0 : i32
    %c0_i32_1 = arith.constant 0 : i32
    return %arg0, %c0_i32, %c0_i32_0 : i32, i32, i32
  }
}

</mosaic_0001>

<bundles_post_ra>
// kernel: tpu_custom_call.1
= control target key start
LH: loop header
LB: loop body
LE: loop exit
PB: predicated region body
PF: predicated region fallthrough
CT: control target
= control target key end

     0   :  { %s928_s0 = inlined_call_operand.hbm [shape: f32[2,8,32], index: 0, kind: input, shape index: {}]   ;;  %s929_s1 = inlined_call_operand.vmem [shape: f32[2,1,32], index: 1, kind: input, shape index: {}]   ;;  %s930_s2 = inlined_call_operand.vmem [shape: f32[2,1,8], index: 2, kind: input, shape index: {}]   ;;  %s931_s3 = inlined_call_operand.hbm [shape: f32[32,32], index: 3, kind: input, shape index: {}]   ;;  %s932_s4 = inlined_call_operand.vmem [shape: f32[1,32], index: 4, kind: input, shape index: {}]   ;;  %s933_s5 = inlined_call_operand.<no memory space> [shape: f32[1,1], index: 5, kind: input, shape index: {}]   ;;  %s934_s6 = inlined_call_operand.hbm [shape: f32[32,96], index: 6, kind: input, shape index: {}]   ;;  %s935_s7 = inlined_call_operand.vmem [shape: f32[1,96], index: 7, kind: input, shape index: {}]   ;;  %s936_s8 = inlined_call_operand.hbm [shape: f32[2,8,96], index: 8, kind: output, shape index: {}]  }
   0x1   :  { %v13_v0 = vstv %s933_s5 }
   0x2   :  { %14 = vst [vmem:[#allocation2] sm:$0x1] %v13_v0 }
   0x3   :  { %15 = vsyncpa [#allocation4], 0 }
   0x4   :  { %16 = vsyncpa [#allocation7], 0 }
   0x5   :  { %17 = vsyncpa [#allocation5], 0  ;;  %s774_s29 = smov [#allocation6]   ;;  %s775_s9 = smov [#allocation3]  }
   0x6   :  { %s39_s30 = sshll.u32 %s774_s29, 4  ;;  %s23_s10 = sshll.u32 %s775_s9, 4  ;;  %s40_s30 = int_to_ptr.vmem [resolvable:$true] %s39_s30  ;;  %s24_s10 = int_to_ptr.vmem [resolvable:$true] %s23_s10 }
   0x7   :  { %s696_s11 = scalar_lea.vmem %s40_s30, 512  ;;  %p701_p1 = scmp.lt.s32.totalorder %s40_s30, %s40_s30 }
   0x8   :  { %p697_p0 = scmp.ne.s32.totalorder %s40_s30, %s696_s11  ;;  %p702_p2 = scmp.lt.s32.totalorder %s696_s11, %s696_s11 }
   0xa   :  { %p703_p3 = por %p702_p2, %p701_p1 }
   0xc   :  { %p704_p4 = pnand %p703_p3, %p697_p0 }
   0xe   :  { %707 = shalt.err (!%p704_p4)
}
   0xf   :  { %s776_s12 = smov 128   ;;  %s777_s13 = smov 8  }
  0x10   :  { %45 = dma.hbm_to_vmem [thread:$0]  %s931_s3, 512, %s40_s30, [#allocation7], %s776_s12, %s776_s12, %s777_s13  }
  0x11   :  { %s716_s15 = scalar_lea.vmem %s24_s10, 256  ;;  %p721_p6 = scmp.lt.s32.totalorder %s24_s10, %s24_s10 }
  0x12   :  { %p717_p5 = scmp.ne.s32.totalorder %s24_s10, %s716_s15  ;;  %p722_p7 = scmp.lt.s32.totalorder %s716_s15, %s716_s15 }
  0x14   :  { %p723_p8 = por %p722_p7, %p721_p6 }
  0x16   :  { %p724_p9 = pnand %p723_p8, %p717_p5 }
  0x18   :  { %727 = shalt.err (!%p724_p9)
}
  0x19   :  { %29 = dma.hbm_to_vmem [thread:$0]  %s928_s0, 256, %s24_s10, [#allocation4], %s776_s12, %s776_s12, %s777_s13  }
  0x1a   :  { %s778_s18 = smov [#allocation8]  }
  0x1b   :  { %s55_s19 = sshll.u32 %s778_s18, 4  ;;  %s56_s19 = int_to_ptr.vmem [resolvable:$true] %s55_s19 }
  0x1c   :  { %s736_s20 = scalar_lea.vmem %s56_s19, 512  ;;  %p741_p11 = scmp.lt.s32.totalorder %s56_s19, %s56_s19 }
  0x1d   :  { %p737_p10 = scmp.ne.s32.totalorder %s56_s19, %s736_s20  ;;  %p742_p12 = scmp.lt.s32.totalorder %s736_s20, %s736_s20 }
  0x1f   :  { %p743_p13 = por %p742_p12, %p741_p11 }
  0x21   :  { %p744_p0 = pnand %p743_p13, %p737_p10 }
  0x23   :  { %747 = shalt.err (!%p744_p0)
}
  0x24   :  { %61 = dma.hbm_to_vmem [thread:$0]  %s934_s6, 512, %s56_s19, [#allocation7], %s776_s12, %s776_s12, %s777_s13  }
  0x25   :  { %768 = dma.done.wait [#allocation4], 256  }
  0x26   :  { %769 = vsyncadd [#allocation4], 4294967040 }
  0x27   :  { %770 = dma.done.wait [#allocation7], 1024  }
  0x28   :  { %771 = vsyncadd [#allocation7], 4294966272  ;;  %vm79_vm0 = vcmask 261120   ;;  %v78_v1 = vld [vmem:[#allocation6 + $0x18] sm:$0xff]  ;;  %v77_v2 = vld [vmem:[#allocation6 + $0x10] sm:$0xff]  ;;  %v779_v8 = vmov 0   ;;  %v212_v22 = vlaneseq }
  0x29   :  { %646 = vmatprep.subr.mxu0 %v78_v1  ;;  %v848_v3 = vld [vmem:[#allocation3] sm:$0xff]  ;;  %v76_v4 = vld [vmem:[#allocation6 + $0x8] sm:$0xff]  ;;  %v75_v5 = vld [vmem:[#allocation6] sm:$0xff]  ;;  %676 = vset.pattern.permute.xlu1 %v779_v8  ;;  %v780_v26 = vmov 1966171168   ;;  %vm440_vm3 = vcmask 58368  }
  0x2a   :  { %647 = vmatpush3.msra.mxu0 %v78_v1  ;;  %654 = vmatprep.mubr.msk.f32.mxu0 %vm79_vm0, %v848_v3  ;;  %v852_v6 = vld [vmem:[#allocation3 + $0x8] sm:$0xff]  ;;  %v630_v7 = vld [vmem:[#allocation2] ss:$0 sm:$0xff]  ;;  %v628_v9 = vld [vmem:[%s929_s1 + $0x1] ss:$0 sm:$0xff]  ;;  %v213_v23 = vshrl.u32 %v212_v22, 7  ;;  %v281_v27 = vunpack.c.l.s4 %v780_v26 }
  0x2b   :  { %648 = vmatprep.subr.mxu0 %v77_v2  ;;  %677 = vset.pattern.permute.xlu0 %v779_v8  ;;  %v627_v11 = vld [vmem:[%s929_s1] ss:$0 sm:$0xff]  ;;  %v381_v24 = vand.u32 127, %v212_v22  ;;  %vm604_vm4 = vcmask 785408   ;;  %s781_s29 = smov [#allocation9]  }
  0x2c   :  { %649 = vmatpush3.msra.mxu0 %v77_v2  ;;  %201 = vperm.xlu1 %676, %v630_v7   ;;  %v629_v17 = vld [vmem:[%s932_s4] ss:$0 sm:$0xff]  ;;  %v282_v29 = vunpack.c.0.s8 %v281_v27  ;;  %v869_v30 = vsub.s32 0, %v213_v23  ;;  %v871_v31 = vsub.s32 1, %v213_v23  ;;  %v222_v32 = vsub.s32 2, %v213_v23  ;;  %s612_s30 = sshll.u32 %s781_s29, 4  ;;  %s613_s30 = int_to_ptr.vmem [resolvable:$true] %s612_s30 }
  0x2d   :  { %650 = vmatprep.subr.mxu0 %v76_v4  ;;  %v867_v25 = vsub.s32 %v381_v24, %v213_v23  ;;  %v226_v33 = vsub.s32 3, %v213_v23  ;;  %v230_v35 = vsub.s32 4, %v213_v23  ;;  %v234_v36 = vsub.s32 5, %v213_v23  ;;  %s748_s9 = scalar_lea.vmem %s613_s30, 256  ;;  %p753_p2 = scmp.lt.s32.totalorder %s613_s30, %s613_s30 }
  0x2e   :  { %651 = vmatpush3.msra.mxu0 %v76_v4  ;;  %v238_v37 = vsub.s32 6, %v213_v23  ;;  %v242_v38 = vsub.s32 7, %v213_v23  ;;  %v873_v40 = vsub.s32 %v282_v29, %v213_v23  ;;  %v206_v29 = vld [vmem:[%s930_s2] sm:$0x1]  ;;  %p749_p1 = scmp.ne.s32.totalorder %s613_s30, %s748_s9  ;;  %p754_p3 = scmp.lt.s32.totalorder %s748_s9, %s748_s9 }
  0x2f   :  { %652 = vmatprep.subr.mxu0 %v75_v5  ;;  %vm208_vm1 = vcmp.eq.f32.partialorder %v206_v29, 0.0 }
  0x30   :  { %653 = vmatpush3.msra.mxu0 %v75_v5  ;;  %p755_p4 = por %p754_p3, %p753_p2 }
  0x31   :  { %655 = vmatmul.mubr.msk.f32.vlgmr.msra.gmra.mxu0 %vm79_vm0, %v852_v6 }
  0x32   :  { %p756_p5 = pnand %p755_p4, %p749_p1 }
  0xa7   :  { %v202_v28 = vpop.permute.xlu1 %201 }
  0xf1   :  { %v656_v10 = vpop.f32.mrf.mxu0 }
  0xf2   :  { %v176_v12 = vadd.f32 %v656_v10, %v628_v9 }
  0xf3   :  { %v152_v13 = vpop.f32.mrf.mxu0 }
  0xf4   :  { %v175_v14 = vadd.f32 %v627_v11, %v152_v13  ;;  %678 = vtanh.f32 %v176_v12 }
  0xf6   :  { %680 = vtanh.f32 %v175_v14 }
 0x101   :  { %v679_v15 = vpop.eup %678 }
 0x102   :  { %v187_v20 = vmul.f32 %v679_v15, %v629_v17 }
 0x103   :  { %v681_v16 = vpop.eup %680 }
 0x104   :  { %v186_v18 = vmul.f32 %v681_v16, %v629_v17  ;;  %v191_v21 = vsel %vm79_vm0, %v187_v20, 0.0 }
 0x106   :  { %v188_v19 = vsel %vm79_vm0, %v186_v18, 0.0 }
 0x107   :  { %189 = vadd.xlane.f32.xlu0 %v188_v19 }
 0x10b   :  { %192 = vadd.xlane.f32.xlu0 %v191_v21 }
 0x190   :  { %v190_v34 = vpop.xlane.xlu0 %189 }
 0x191   :  { %v204_v39 = vadd.f32 %v202_v28, %v190_v34 }
 0x193   :  { %v215_v41 = vrot.slane %v204_v39, %v869_v30  ;;  %v219_v42 = vrot.slane %v204_v39, %v871_v31  ;;  %v223_v43 = vrot.slane %v204_v39, %v222_v32  ;;  %v227_v44 = vrot.slane %v204_v39, %v226_v33 }
 0x194   :  { %v193_v45 = vpop.xlane.xlu0 %192  ;;  %v231_v46 = vrot.slane %v204_v39, %v230_v35  ;;  %v235_v47 = vrot.slane %v204_v39, %v234_v36  ;;  %v239_v48 = vrot.slane %v204_v39, %v238_v37  ;;  %v243_v49 = vrot.slane %v204_v39, %v242_v38 }
 0x195   :  { %v205_v50 = vadd.f32 %v202_v28, %v193_v45  ;;  %v276_v51 = vcombine.low %v215_v41, %v219_v42  ;;  %v277_v52 = vcombine.low %v223_v43, %v227_v44 }
 0x196   :  { %v278_v53 = vcombine.low %v231_v46, %v235_v47  ;;  %v279_v54 = vcombine.low %v239_v48, %v243_v49 }
 0x197   :  { %v286_v55 = vrot.slane %v276_v51, %v873_v40  ;;  %v293_v56 = vrot.slane %v277_v52, %v873_v40  ;;  %v247_v57 = vrot.slane %v205_v50, %v869_v30  ;;  %v251_v58 = vrot.slane %v205_v50, %v871_v31 }
 0x198   :  { %v300_v59 = vrot.slane %v278_v53, %v873_v40  ;;  %v307_v60 = vrot.slane %v279_v54, %v873_v40  ;;  %v255_v61 = vrot.slane %v205_v50, %v222_v32  ;;  %v259_v62 = vrot.slane %v205_v50, %v226_v33  ;;  %v207_v32 = vld [vmem:[%s930_s2 + $0x1] sm:$0x1] }
 0x199   :  { %v308_v63 = vcombine.low %v286_v55, %v293_v56  ;;  %v263_v0 = vrot.slane %v205_v50, %v230_v35  ;;  %v267_v1 = vrot.slane %v205_v50, %v234_v36  ;;  %v271_v2 = vrot.slane %v205_v50, %v238_v37  ;;  %v515_v55 = vld [vmem:[#allocation8 + $0x18] sm:$0xff]  ;;  %v514_v56 = vld [vmem:[#allocation8 + $0x10] sm:$0xff] }
 0x19a   :  { %v309_v4 = vcombine.low %v300_v59, %v307_v60  ;;  %v275_v5 = vrot.slane %v205_v50, %v242_v38  ;;  %v325_v7 = vcombine.low %v247_v57, %v251_v58  ;;  %v326_v8 = vcombine.low %v255_v61, %v259_v62  ;;  %657 = vmatprep.subr.mxu1 %v515_v55  ;;  %v513_v57 = vld [vmem:[#allocation8 + $0x8] sm:$0xff]  ;;  %v512_v59 = vld [vmem:[#allocation8] sm:$0xff] }
 0x19b   :  { %v316_v9 = vrot.slane %v308_v63, %v873_v40  ;;  %v327_v10 = vcombine.low %v263_v0, %v267_v1  ;;  %vm209_vm2 = vcmp.eq.f32.partialorder %v207_v32, 0.0  ;;  %658 = vmatpush3.msra.mxu1 %v515_v55 }
 0x19c   :  { %v323_v11 = vrot.slane %v309_v4, %v873_v40  ;;  %v328_v12 = vcombine.low %v271_v2, %v275_v5  ;;  %v335_v13 = vrot.slane %v325_v7, %v873_v40  ;;  %v342_v14 = vrot.slane %v326_v8, %v873_v40  ;;  %659 = vmatprep.subr.mxu1 %v514_v56 }
 0x19d   :  { %v349_v15 = vrot.slane %v327_v10, %v873_v40  ;;  %660 = vmatpush3.msra.mxu1 %v514_v56 }
 0x19e   :  { %v324_v16 = vcombine.low %v316_v9, %v323_v11  ;;  %v356_v17 = vrot.slane %v328_v12, %v873_v40  ;;  %v357_v18 = vcombine.low %v335_v13, %v342_v14  ;;  %661 = vmatprep.subr.mxu1 %v513_v57 }
 0x19f   :  { %662 = vmatpush3.msra.mxu1 %v513_v57 }
 0x1a0   :  { %375 = vperm.xlu1 %676, %v324_v16   ;;  %v358_v19 = vcombine.low %v349_v15, %v356_v17  ;;  %v365_v20 = vrot.slane %v357_v18, %v873_v40  ;;  %663 = vmatprep.subr.mxu1 %v512_v59 }
 0x1a1   :  { %664 = vmatpush3.msra.mxu1 %v512_v59 }
 0x1a2   :  { %v372_v21 = vrot.slane %v358_v19, %v873_v40 }
 0x1a4   :  { %v373_v22 = vcombine.low %v365_v20, %v372_v21 }
 0x1a6   :  { %378 = vperm.xlu0 %677, %v373_v22  }
 0x21b   :  { %v376_v23 = vpop.permute.xlu1 %375 }
 0x21c   :  { %v385_v24 = vrot.slane %v376_v23, %v867_v25 }
 0x21e   :  { %v396_v26 = vrot.slane %v385_v24, %v873_v40 }
 0x220   :  { %v403_v33 = vrot.slane %v396_v26, %v873_v40 }
 0x221   :  { %v379_v27 = vpop.permute.xlu0 %378 }
 0x222   :  { %v389_v28 = vrot.slane %v379_v27, %v867_v25  ;;  %v420_v36 = vsel %vm208_vm1, %v403_v33, %v206_v29 }
 0x224   :  { %v410_v34 = vrot.slane %v389_v28, %v873_v40 }
 0x226   :  { %v417_v35 = vrot.slane %v410_v34, %v873_v40 }
 0x228   :  { %v421_v37 = vsel %vm209_vm2, %v417_v35, %v207_v32 }
 0x229   :  { %v424_v38 = vcombine.low %v420_v36, %v421_v37 }
 0x22b   :  { %v431_v25 = vrot.slane %v424_v38, %v873_v40 }
 0x22d   :  { %v438_v39 = vrot.slane %v431_v25, %v873_v40 }
 0x22f   :  { %v441_v41 = vsel %vm440_vm3, %v438_v39, -inf }
 0x230   :  { %442 = vmax.xlane.f32.xlu1 %v441_v41 }
 0x2b9   :  { %v443_v42 = vpop.xlane.xlu1 %442 }
 0x2ba   :  { %v448_v43 = vrot.slane %v443_v42, %v869_v30  ;;  %v452_v44 = vrot.slane %v443_v42, %v871_v31 }
 0x2bc   :  { %v455_v45 = vsub.f32 %v420_v36, %v448_v43  ;;  %v456_v46 = vsub.f32 %v421_v37, %v452_v44 }
 0x2be   :  { %v457_v47 = vmul.f32 1.442695, %v455_v45  ;;  %v459_v48 = vmul.f32 1.442695, %v456_v46 }
 0x2c0   :  { %682 = vpow2.f32 %v457_v47 }
 0x2c1   :  { %684 = vpow2.f32 %v459_v48 }
 0x2cd   :  { %v683_v49 = vpop.eup %682 }
 0x2ce   :  { %v685_v50 = vpop.eup %684 }
 0x2cf   :  { %v463_v51 = vcombine.low %v683_v49, %v685_v50 }
 0x2d1   :  { %v470_v52 = vrot.slane %v463_v51, %v873_v40 }
 0x2d3   :  { %v477_v53 = vrot.slane %v470_v52, %v873_v40 }
 0x2d5   :  { %v479_v54 = vsel %vm440_vm3, %v477_v53, 0.0 }
 0x2d6   :  { %480 = vadd.xlane.f32.xlu1 %v479_v54 }
 0x35f   :  { %v481_v58 = vpop.xlane.xlu1 %480 }
 0x360   :  { %686 = vrcp.f32 %v481_v58 }
 0x36d   :  { %v687_v60 = vpop.eup %686 }
 0x36e   :  { %v491_v40 = vrot.slane %v687_v60, %v871_v31  ;;  %v487_v61 = vrot.slane %v687_v60, %v869_v30  ;;  %v631_v31 = vld [vmem:[%s935_s7] ss:$0 sm:$0xff] }
 0x370   :  { %v495_v62 = vmul.f32 %v685_v50, %v491_v40  ;;  %v494_v63 = vmul.f32 %v683_v49, %v487_v61 }
 0x372   :  { %v506_v0 = vrot.slane %v495_v62, %v869_v30  ;;  %v499_v1 = vrot.slane %v494_v63, %v869_v30 }
 0x374   :  { %508 = vbcast.lane.b32.xlu0 %v506_v0, 256  ;;  %501 = vbcast.lane.b32.xlu1 %v499_v1, 256 }
 0x3e6   :  { %v509_v2 = vpop.permute.xlu0 %508  ;;  %v502_v4 = vpop.permute.xlu1 %501 }
 0x3e7   :  { %v511_v5 = vmul.f32 %v509_v2, %v852_v6  ;;  %v510_v7 = vmul.f32 %v502_v4, %v848_v3 }
 0x3e9   :  { %665 = vmatprep.mubr.msk.f32.mxu1 %vm79_vm0, %v510_v7 }
 0x3ea   :  { %666 = vmatmul.mubr.msk.f32.vlgmr.msra.gmra.mxu1 %vm79_vm0, %v511_v5 }
 0x4aa   :  { %v667_v8 = vpop.f32.mrf.mxu1 }
 0x4ab   :  { %v601_v30 = vadd.f32 %v667_v8, %v631_v31 }
 0x4ac   :  { %v595_v9 = vpop.f32.mrf.mxu1 }
 0x4ad   :  { %v596_v10 = vadd.f32 %v631_v31, %v595_v9  ;;  %606 = vst.msk [vmem:[#allocation9 + $0x8] sm:$0xff] %vm604_vm4, %v601_v30 }
 0x4af   :  { %605 = vst.msk [vmem:[#allocation9] sm:$0xff] %vm604_vm4, %v596_v10 }
 0x4b0   :  { %759 = shalt.err (!%p756_p5)
}
 0x4b1   :  { %618 = dma.vmem_to_hbm [thread:$0]  %s613_s30, 256, %s936_s8, [#allocation5], %s776_s12, %s776_s12, %s777_s13  }
 0x4b2   :  { %772 = dma.done.wait [#allocation5], 256  }
 0x4b3   :  { %773 = vsyncadd [#allocation5], 4294967040 }
 0x4b4   :  { %622 = vsyncpa [#allocation4], 1 }
 0x4b5   :  { %623 = vsyncpa [#allocation7], 1 }
 0x4b6   :  { %624 = vsyncpa [#allocation5], 1 }

</bundles_post_ra>
